<compile_context>
chip_gen: v6e
topology: v6e:2x2x1
jax: 0.10.0
libtpu: 0.0.40
codegen_flags: <defaults>
</compile_context>

<pallas_src>
import functools
import math

import jax
import jax.numpy as jnp
from jax.experimental import pallas as pl
from jax.experimental.pallas import tpu as pltpu


# --------------------------------------------------------------------------------------
# Kernels
# --------------------------------------------------------------------------------------
def _residual_tiled_kernel(x_ref, w_ref, g_ref, b_ref, out_ref, *,
                           eps, n_bn_tiles, tile_c):
    """Fused-concat grid kernel.

    Grid step j <  n_bn_tiles : compute BN/ReLU feature tile j of the output.
    Grid step j >= n_bn_tiles : copy column tile (j - n_bn_tiles) of x into the trailing
                                D_in columns of the output (the concat).
    """
    j = pl.program_id(0)

    @pl.when(j < n_bn_tiles)
    def _bn_tile():
        x = x_ref[...]                                     # (N, D_in)  f32
        w = w_ref[...]                                     # (D_in, T)  compute dtype
        # Linear; bias omitted: it cancels exactly under training-mode BN mean subtraction.
        y = jnp.dot(x.astype(w.dtype), w,
                    preferred_element_type=jnp.float32)    # (N, T)     f32 accumulate
        # BatchNorm1d, training mode (biased variance), two-pass stats on the resident tile.
        mean = jnp.mean(y, axis=0, keepdims=True)          # (1, T)
        c = y - mean
        var = jnp.mean(c * c, axis=0, keepdims=True)
        scale = g_ref[...] * jax.lax.rsqrt(var + eps)      # fold gamma * inv_std
        out_ref[...] = jnp.maximum(c * scale + b_ref[...], 0.0)

    @pl.when(j >= n_bn_tiles)
    def _copy_tile():
        col0 = pl.multiple_of((j - n_bn_tiles) * tile_c, 128)
        out_ref[...] = x_ref[:, pl.ds(col0, tile_c)]


def _residual_full_kernel(x_ref, w_ref, g_ref, b_ref, out_ref, *, eps):
    """Single-block fallback for shapes whose feature dims are not 128-aligned (tiny shapes)."""
    d_in = x_ref.shape[1]
    d_out = w_ref.shape[1]
    x = x_ref[...]
    y = jnp.dot(x.astype(w_ref.dtype), w_ref[...], preferred_element_type=jnp.float32)
    mean = jnp.mean(y, axis=0, keepdims=True)
    c = y - mean
    var = jnp.mean(c * c, axis=0, keepdims=True)
    scale = g_ref[...] * jax.lax.rsqrt(var + eps)
    out_ref[:, 0:d_out] = jnp.maximum(c * scale + b_ref[...], 0.0)
    out_ref[:, d_out:d_out + d_in] = x                      # concat([bn_relu, x], axis=1)


# --------------------------------------------------------------------------------------
# Wrapper / sizing
# --------------------------------------------------------------------------------------
def prepare_params(w, compute_dtype=jnp.bfloat16):
    """PyTorch-layout weight (D_out, D_in) -> (D_in, D_out), cast ONCE to the MXU dtype.

    bf16 operands feed the bf16-native MXUs (v5e/v6e/v7x) and halve weight DMA/VMEM.
    Pass compute_dtype=jnp.float32 for exact f32 parity."""
    return jnp.asarray(w).T.astype(compute_dtype)


def _vmem_limit_bytes():
    kind = ""
    try:
        kind = jax.devices()[0].device_kind.lower()
    except Exception:
        pass
    if "v7" in kind or "7x" in kind:
        return 44 * 1024 * 1024            # v7x: 64 MiB physical VMEM per TensorCore
    if "v5" in kind or "v6" in kind:
        return 80 * 1024 * 1024            # v5e/v6e: 128 MiB physical VMEM
    return 32 * 1024 * 1024                # unknown: conservative


def _pick_tile_c(n, d_in, d_out, w_itemsize, vmem_limit):
    """Column-tile width for the fused-concat grid.

    Must divide both D_out and D_in (so every output tile lies entirely in the BN region or
    the x region) and be a multiple of 128. Prefers 256-multiples (v6e/v7x 2x256x256 MXU) and
    the largest width whose working set fits the per-generation VMEM budget."""
    if d_out % 128 or d_in % 128:
        return None
    g = math.gcd(d_out, d_in)
    budget = int(0.85 * vmem_limit)
    for c in (1024, 512, 256, 128):
        if g % c:
            continue
        est = (4 * n * d_in                  # x, single-buffered, f32
               + 2 * w_itemsize * d_in * c   # weight tile, double-buffered
               + 2 * 4 * n * c               # output tile, double-buffered
               + 3 * 4 * n * c               # y / centred-y / result temporaries
               + 4 * 4 * c)                  # gamma / beta tiles
        if est <= budget:
            return c
    return 128


def _clamp_index_map(n_bn_tiles):
    # Copy steps re-use the last BN tile's block index -> Pallas skips the (unused) refetch.
    def index_map(j):
        return (0, jnp.minimum(j, n_bn_tiles - 1))
    return index_map


def residual_forward(x, w_c, gamma, beta, *, eps=1e-5, tile_c=None):
    """x: (N, D_in) f32. w_c: (D_in, D_out) pre-transposed weight from prepare_params.

    Returns concat([relu(batchnorm_train(x @ W.T + b)), x], axis=1) of shape (N, D_out+D_in),
    emitted directly by the pallas_call (no wrapper-side concatenate)."""
    n, d_in = x.shape
    d_in_w, d_out = w_c.shape
    assert d_in_w == d_in, (w_c.shape, x.shape)

    x = x.astype(jnp.float32)
    g2 = gamma.reshape(1, d_out).astype(jnp.float32)
    b2 = beta.reshape(1, d_out).astype(jnp.float32)

    vmem_limit = _vmem_limit_bytes()
    w_itemsize = jnp.dtype(w_c.dtype).itemsize
    if tile_c is None:
        tile_c = _pick_tile_c(n, d_in, d_out, w_itemsize, vmem_limit)

    out_shape = jax.ShapeDtypeStruct((n, d_out + d_in), jnp.float32)
    cost = pl.CostEstimate(
        flops=2 * n * d_in * d_out,
        transcendentals=d_out,                               # one rsqrt per feature
        bytes_accessed=(4 * n * d_in
                        + w_itemsize * d_in * d_out
                        + 8 * d_out
                        + 4 * n * (d_out + d_in)),
    )
    cparams = pltpu.CompilerParams(
        dimension_semantics=("parallel",),
        vmem_limit_bytes=vmem_limit,
    )

    if tile_c is None:
        # Non-128-aligned feature dims: single-block kernel (intended for small shapes only).
        kernel = functools.partial(_residual_full_kernel, eps=eps)
        return pl.pallas_call(
            kernel,
            out_shape=out_shape,
            grid_spec=pltpu.PrefetchScalarGridSpec(
                num_scalar_prefetch=0,
                grid=(1,),
                in_specs=[
                    pl.BlockSpec((n, d_in), lambda j: (0, 0)),
                    pl.BlockSpec((d_in, d_out), lambda j: (0, 0)),
                    pl.BlockSpec((1, d_out), lambda j: (0, 0)),
                    pl.BlockSpec((1, d_out), lambda j: (0, 0)),
                ],
                out_specs=pl.BlockSpec((n, d_out + d_in), lambda j: (0, 0)),
            ),
            compiler_params=cparams,
            cost_estimate=cost,
        )(x, w_c, g2, b2)

    assert d_out % tile_c == 0 and d_in % tile_c == 0, (d_out, d_in, tile_c)
    n_bn = d_out // tile_c
    n_cp = d_in // tile_c
    grid = (n_bn + n_cp,)      # always >= 2 tiles -> both v7x TensorCores get work
    kernel = functools.partial(_residual_tiled_kernel, eps=eps,
                               n_bn_tiles=n_bn, tile_c=tile_c)
    clamp = _clamp_index_map(n_bn)

    def call(single_buffer_x):
        if single_buffer_x:
            # x's block index is constant across the grid: one buffer suffices.
            x_spec = pl.BlockSpec((n, d_in), lambda j: (0, 0),
                                  pipeline_mode=pl.Buffered(1))
        else:
            x_spec = pl.BlockSpec((n, d_in), lambda j: (0, 0))
        return pl.pallas_call(
            kernel,
            out_shape=out_shape,
            grid_spec=pltpu.PrefetchScalarGridSpec(
                num_scalar_prefetch=0,
                grid=grid,
                in_specs=[
                    x_spec,                                  # x: full, resident
                    pl.BlockSpec((d_in, tile_c), clamp),     # weight feature tile
                    pl.BlockSpec((1, tile_c), clamp),        # gamma tile
                    pl.BlockSpec((1, tile_c), clamp),        # beta tile
                ],
                out_specs=pl.BlockSpec((n, tile_c), lambda j: (0, j)),
            ),
            compiler_params=cparams,
            cost_estimate=cost,
        )(x, w_c, g2, b2)

    try:
        return call(single_buffer_x=True)
    except Exception:
        # pl.Buffered(1) not supported by this jax version -> default double buffering.
        return call(single_buffer_x=False)


def _residual_xla(x, w_c, gamma, beta, eps=1e-5):
    y = jnp.dot(x.astype(w_c.dtype), w_c, preferred_element_type=jnp.float32)
    mean = y.mean(axis=0, keepdims=True)
    c = y - mean
    var = (c * c).mean(axis=0, keepdims=True)
    out = jnp.maximum(c * jax.lax.rsqrt(var + eps) * gamma + beta, 0.0)
    return jnp.concatenate([out, x.astype(jnp.float32)], axis=1)


def residual(x, w_c, gamma, beta, *, eps=1e-5, min_n=128, min_d_out=256):
    """Size-based dispatch: at tiny shapes the MXU is <6% utilised and a custom call is pure
    pipeline overhead, so use plain XLA; use the Pallas kernel at realistic sizes."""
    if x.shape[0] < min_n or w_c.shape[1] < min_d_out:
        return _residual_xla(x, w_c, gamma, beta, eps=eps)
    return residual_forward(x, w_c, gamma, beta, eps=eps)


# --------------------------------------------------------------------------------------
# Reference + tests
# --------------------------------------------------------------------------------------
def residual_reference(x, w, b, gamma, beta, eps=1e-5, compute_dtype=jnp.float32):
    """Pure-JAX reference matching PyTorch Residual.forward in training mode (with bias).
    compute_dtype mirrors the kernel's MXU operand dtype."""
    y = jnp.dot(x.astype(compute_dtype), w.T.astype(compute_dtype),
                preferred_element_type=jnp.float32) + b
    mean = y.mean(axis=0, keepdims=True)
    var = ((y - mean) ** 2).mean(axis=0, keepdims=True)
    out = (y - mean) / jnp.sqrt(var + eps) * gamma + beta
    out = jnp.maximum(out, 0.0)
    return jnp.concatenate([out, x], axis=1)


def _run_case(key, n, d_in, d_out, compute_dtype, tol):
    k_x, k_w, k_b = jax.random.split(key, 3)
    x = jax.random.normal(k_x, (n, d_in), dtype=jnp.float32)
    bound = 1.0 / (d_in ** 0.5)
    w = jax.random.uniform(k_w, (d_out, d_in), minval=-bound, maxval=bound, dtype=jnp.float32)
    b = jax.random.uniform(k_b, (d_out,), minval=-bound, maxval=bound, dtype=jnp.float32)
    gamma = jnp.ones((d_out,), jnp.float32)      # BatchNorm1d default weight
    beta = jnp.zeros((d_out,), jnp.float32)      # BatchNorm1d default bias

    w_c = prepare_params(w, compute_dtype)       # transpose + cast once, at "load time"
    out = jax.block_until_ready(residual_forward(x, w_c, gamma, beta))
    assert out.shape == (n, d_out + d_in), out.shape

    ref = residual_reference(x, w, b, gamma, beta, compute_dtype=compute_dtype)
    err = float(jnp.max(jnp.abs(out - ref)))
    assert err < tol, (err, tol)
    return out


if __name__ == "__main__":
    key = jax.random.PRNGKey(0)
    k0, k1 = jax.random.split(key)

    # Small shapes implied by the module (batch=8, input_dim=16, output_dim=32):
    # exact f32 parity with the PyTorch forward (training-mode BN), single-block kernel.
    _run_case(k0, n=8, d_in=16, d_out=32, compute_dtype=jnp.float32, tol=1e-4)

    # Lane-aligned shapes exercising the fused-concat grid (2 BN tiles + 1 x-copy tile)
    # with bf16 MXU operands / f32 accumulation and batch statistics.
    _run_case(k1, n=64, d_in=128, d_out=256, compute_dtype=jnp.bfloat16, tol=2e-3)

    print("KERNEL_OK")
</pallas_src>

<mosaic_0001>
module attributes {stable_mosaic.version = 11 : i64} {
  func.func @_residual_full_kernel(%arg0: i32, %arg1: memref<8x16xf32, #tpu.memory_space<vmem>>, %arg2: memref<16x32xf32, #tpu.memory_space<vmem>>, %arg3: memref<1x32xf32, #tpu.memory_space<vmem>>, %arg4: memref<1x32xf32, #tpu.memory_space<vmem>>, %arg5: memref<8x48xf32, #tpu.memory_space<vmem>>) attributes {dimension_semantics = [#tpu.dimension_semantics<parallel>], iteration_bounds = array<i64: 1>, scalar_prefetch = 0 : i64, scratch_operands = 0 : i64, tpu.core_type = #tpu.core_type<tc>, window_params = [{pipeline_mode = #tpu.pipeline_mode<synchronous>, transform_indices = @transform_0, window_bounds = array<i64: 8, 16>}, {pipeline_mode = #tpu.pipeline_mode<synchronous>, transform_indices = @transform_1, window_bounds = array<i64: 16, 32>}, {pipeline_mode = #tpu.pipeline_mode<synchronous>, transform_indices = @transform_2, window_bounds = array<i64: 1, 32>}, {pipeline_mode = #tpu.pipeline_mode<synchronous>, transform_indices = @transform_3, window_bounds = array<i64: 1, 32>}, {pipeline_mode = #tpu.pipeline_mode<synchronous>, transform_indices = @transform_4, window_bounds = array<i64: 8, 48>}]} {
    %c0 = arith.constant 0 : index
    %c0_0 = arith.constant 0 : index
    %0 = vector.load %arg1[%c0, %c0_0] : memref<8x16xf32, #tpu.memory_space<vmem>>, vector<8x16xf32>
    %c0_1 = arith.constant 0 : index
    %c0_2 = arith.constant 0 : index
    %1 = vector.load %arg2[%c0_1, %c0_2] : memref<16x32xf32, #tpu.memory_space<vmem>>, vector<16x32xf32>
    %cst = arith.constant dense<0.000000e+00> : vector<8x32xf32>
    %2 = tpu.matmul %0, %1, %cst {dimension_numbers = #tpu.dot_dimension_numbers<[1], [0], [0], [1], [0, 0, 1, 1], [], []>} : vector<8x16xf32>, vector<16x32xf32>, vector<8x32xf32> -> vector<8x32xf32>
    %cst_3 = arith.constant dense<0.000000e+00> : vector<32xf32>
    %3 = vector.multi_reduction <add>, %2, %cst_3 [0] : vector<8x32xf32> to vector<32xf32>
    %4 = vector.shape_cast %3 : vector<32xf32> to vector<1x32xf32>
    %cst_4 = arith.constant 8.000000e+00 : f32
    %5 = vector.broadcast %cst_4 : f32 to vector<1x32xf32>
    %6 = arith.divf %4, %5 : vector<1x32xf32>
    %7 = vector.broadcast %6 : vector<1x32xf32> to vector<8x32xf32>
    %8 = arith.subf %2, %7 : vector<8x32xf32>
    %9 = arith.mulf %8, %8 : vector<8x32xf32>
    %cst_5 = arith.constant dense<0.000000e+00> : vector<32xf32>
    %10 = vector.multi_reduction <add>, %9, %cst_5 [0] : vector<8x32xf32> to vector<32xf32>
    %11 = vector.shape_cast %10 : vector<32xf32> to vector<1x32xf32>
    %cst_6 = arith.constant 8.000000e+00 : f32
    %12 = vector.broadcast %cst_6 : f32 to vector<1x32xf32>
    %13 = arith.divf %11, %12 : vector<1x32xf32>
    %c0_7 = arith.constant 0 : index
    %c0_8 = arith.constant 0 : index
    %14 = vector.load %arg3[%c0_7, %c0_8] : memref<1x32xf32, #tpu.memory_space<vmem>>, vector<1x32xf32>
    %cst_9 = arith.constant 9.99999974E-6 : f32
    %15 = vector.broadcast %cst_9 : f32 to vector<1x32xf32>
    %16 = arith.addf %13, %15 : vector<1x32xf32>
    %17 = math.rsqrt %16 : vector<1x32xf32>
    %18 = arith.mulf %14, %17 : vector<1x32xf32>
    %19 = vector.broadcast %18 : vector<1x32xf32> to vector<8x32xf32>
    %20 = arith.mulf %8, %19 : vector<8x32xf32>
    %c0_10 = arith.constant 0 : index
    %c0_11 = arith.constant 0 : index
    %21 = vector.load %arg4[%c0_10, %c0_11] : memref<1x32xf32, #tpu.memory_space<vmem>>, vector<1x32xf32>
    %22 = vector.broadcast %21 : vector<1x32xf32> to vector<8x32xf32>
    %23 = arith.addf %20, %22 : vector<8x32xf32>
    %cst_12 = arith.constant 0.000000e+00 : f32
    %24 = vector.broadcast %cst_12 : f32 to vector<8x32xf32>
    %25 = arith.maximumf %23, %24 : vector<8x32xf32>
    %c0_13 = arith.constant 0 : index
    %c0_14 = arith.constant 0 : index
    %26 = vector.load %arg5[%c0_13, %c0_14] : memref<8x48xf32, #tpu.memory_space<vmem>>, vector<8x32xf32>
    tpu.vector_store %arg5[%c0_13, %c0_14], %25 {strides = array<i32>} : memref<8x48xf32, #tpu.memory_space<vmem>>, vector<8x32xf32>,
    %c0_15 = arith.constant 0 : index
    %c32 = arith.constant 32 : index
    %27 = vector.load %arg5[%c0_15, %c32] : memref<8x48xf32, #tpu.memory_space<vmem>>, vector<8x16xf32>
    tpu.vector_store %arg5[%c0_15, %c32], %0 {strides = array<i32>} : memref<8x48xf32, #tpu.memory_space<vmem>>, vector<8x16xf32>,
    return
  }
  func.func @transform_0(%arg0: i32) -> (i32, i32) {
    %c0_i32 = arith.constant 0 : i32
    %c0_i32_0 = arith.constant 0 : i32
    %c0_i32_1 = arith.constant 0 : i32
    return %c0_i32, %c0_i32_0 : i32, i32
  }
  func.func @transform_1(%arg0: i32) -> (i32, i32) {
    %c0_i32 = arith.constant 0 : i32
    %c0_i32_0 = arith.constant 0 : i32
    %c0_i32_1 = arith.constant 0 : i32
    return %c0_i32, %c0_i32_0 : i32, i32
  }
  func.func @transform_2(%arg0: i32) -> (i32, i32) {
    %c0_i32 = arith.constant 0 : i32
    %c0_i32_0 = arith.constant 0 : i32
    %c0_i32_1 = arith.constant 0 : i32
    return %c0_i32, %c0_i32_0 : i32, i32
  }
  func.func @transform_3(%arg0: i32) -> (i32, i32) {
    %c0_i32 = arith.constant 0 : i32
    %c0_i32_0 = arith.constant 0 : i32
    %c0_i32_1 = arith.constant 0 : i32
    return %c0_i32, %c0_i32_0 : i32, i32
  }
  func.func @transform_4(%arg0: i32) -> (i32, i32) {
    %c0_i32 = arith.constant 0 : i32
    %c0_i32_0 = arith.constant 0 : i32
    %c0_i32_1 = arith.constant 0 : i32
    return %c0_i32, %c0_i32_0 : i32, i32
  }
}

</mosaic_0001>

<bundles_post_ra>
// kernel: tpu_custom_call.1
= control target key start
LH: loop header
LB: loop body
LE: loop exit
PB: predicated region body
PF: predicated region fallthrough
CT: control target
= control target key end

     0   :  { %9 = vsyncpa [#allocation3], 0  ;;  %s322_s0 = inlined_call_operand.hbm [shape: f32[8,16], index: 0, kind: input, shape index: {}]   ;;  %s323_s1 = inlined_call_operand.hbm [shape: f32[16,32], index: 1, kind: input, shape index: {}]   ;;  %s324_s2 = inlined_call_operand.vmem [shape: f32[1,32], index: 2, kind: input, shape index: {}]   ;;  %s325_s3 = inlined_call_operand.vmem [shape: f32[1,32], index: 3, kind: input, shape index: {}]   ;;  %s326_s4 = inlined_call_operand.hbm [shape: f32[8,48], index: 4, kind: output, shape index: {}]  }
   0x1   :  { %10 = vsyncpa [#allocation6], 0 }
   0x2   :  { %11 = vsyncpa [#allocation4], 0  ;;  %s271_s15 = smov [#allocation2]   ;;  %s272_s17 = smov [#allocation5]  }
   0x3   :  { %s18_s16 = sshll.u32 %s271_s15, 4  ;;  %s27_s18 = sshll.u32 %s272_s17, 4  ;;  %s19_s16 = int_to_ptr.vmem [resolvable:$true] %s18_s16  ;;  %s28_s18 = int_to_ptr.vmem [resolvable:$true] %s27_s18 }
   0x4   :  { %s213_s19 = scalar_lea.vmem %s19_s16, 128  ;;  %p218_p1 = scmp.lt.s32.totalorder %s19_s16, %s19_s16 }
   0x5   :  { %p214_p0 = scmp.ne.s32.totalorder %s19_s16, %s213_s19  ;;  %p219_p2 = scmp.lt.s32.totalorder %s213_s19, %s213_s19 }
   0x7   :  { %p220_p3 = por %p219_p2, %p218_p1 }
   0x9   :  { %p221_p4 = pnand %p220_p3, %p214_p0 }
   0xb   :  { %224 = shalt.err (!%p221_p4)
}
   0xc   :  { %21 = dma.hbm_to_vmem [thread:$0]  %s322_s0, 128, %s19_s16, [#allocation3]  }
   0xd   :  { %s233_s22 = scalar_lea.vmem %s28_s18, 256  ;;  %p238_p6 = scmp.lt.s32.totalorder %s28_s18, %s28_s18 }
   0xe   :  { %p234_p5 = scmp.ne.s32.totalorder %s28_s18, %s233_s22  ;;  %p239_p7 = scmp.lt.s32.totalorder %s233_s22, %s233_s22 }
  0x10   :  { %p240_p8 = por %p239_p7, %p238_p6 }
  0x12   :  { %p241_p9 = pnand %p240_p8, %p234_p5 }
  0x14   :  { %244 = shalt.err (!%p241_p9)
}
  0x15   :  { %s273_s23 = smov 128   ;;  %s274_s24 = smov 8  }
  0x16   :  { %33 = dma.hbm_to_vmem [thread:$0]  %s323_s1, 256, %s28_s18, [#allocation6], %s273_s23, %s273_s23, %s274_s24  }
  0x17   :  { %265 = dma.done.wait [#allocation3], 128  }
  0x18   :  { %266 = vsyncadd [#allocation3], 4294967168 }
  0x19   :  { %267 = dma.done.wait [#allocation6], 256  }
  0x1a   :  { %268 = vsyncadd [#allocation6], 4294967040  ;;  %v275_v0 = vmov 0.0   ;;  %vm276_vm0 = vmmov 0   ;;  %v46_v1 = vld [vmem:[#allocation5 + $0x8] sm:$0xff]  ;;  %v45_v2 = vld [vmem:[#allocation5] sm:$0xff]  ;;  %v146_v25 = vlaneseq }
  0x1b   :  { %188 = vmatprep.subr.mxu0 %v275_v0  ;;  %192 = vmatprep.mubr.msk.f32.mxu0 %vm276_vm0, %v275_v0  ;;  %v44_v3 = vld [vmem:[#allocation2] sm:$0xff]  ;;  %vm47_vm1 = vcmask 130048   ;;  %s277_s0 = smov 32   ;;  %vm121_vm2 = vcmask 261120   ;;  %s278_s30 = smov [#allocation7]   ;;  %vm165_vm3 = vcmask 392448  }
  0x1c   :  { %189 = vmatpush3.msra.mxu0 %v46_v1  ;;  %162 = vrot.lane.b32.xlu0 %v44_v3, %s277_s0  ;;  %v147_v26 = vshrl.u32 %v146_v25, 7  ;;  %v141_v27 = vld [vmem:[%s324_s2] sm:$0x1]  ;;  %s173_s5 = sshll.u32 %s278_s30, 4  ;;  %s174_s5 = int_to_ptr.vmem [resolvable:$true] %s173_s5 }
  0x1d   :  { %190 = vmatprep.subr.mxu0 %v275_v0  ;;  %v184_v32 = vld [vmem:[%s325_s3] ss:$0 sm:$0xff]  ;;  %s245_s2 = scalar_lea.vmem %s174_s5, 128  ;;  %p250_p11 = scmp.lt.s32.totalorder %s174_s5, %s174_s5 }
  0x1e   :  { %191 = vmatpush3.msra.mxu0 %v45_v2  ;;  %v148_v28 = vsub.s32 0, %v147_v26  ;;  %p246_p10 = scmp.ne.s32.totalorder %s174_s5, %s245_s2  ;;  %p251_p12 = scmp.lt.s32.totalorder %s245_s2, %s245_s2 }
  0x1f   :  { %193 = vmatmul.mubr.msk.f32.vlgmr.msra.gmra.mxu0 %vm47_vm1, %v44_v3 }
  0x20   :  { %p252_p13 = por %p251_p12, %p250_p11 }
  0x22   :  { %p253_p0 = pnand %p252_p13, %p246_p10 }
  0x8e   :  { %v163_v36 = vpop.permute.xlu0 %162 }
  0xdf   :  { %v117_v4 = vpop.f32.mrf.mxu0 }
  0xe0   :  { %v122_v5 = vsel %vm121_vm2, %v117_v4, 0.0 }
  0xe1   :  { %v123_v6 = vrot.slane %v122_v5, 4  ;;  %v194_v7 = vpop.f32.mrf.mxu0 }
  0xe3   :  { %v124_v8 = vadd.f32 %v123_v6, %v122_v5 }
  0xe5   :  { %v125_v9 = vrot.slane %v124_v8, 2 }
  0xe7   :  { %v126_v10 = vadd.f32 %v125_v9, %v124_v8 }
  0xe9   :  { %v127_v11 = vrot.slane %v126_v10, 1 }
  0xeb   :  { %v128_v12 = vadd.f32 %v127_v11, %v126_v10 }
  0xed   :  { %v130_v13 = vmul.f32 0.125, %v128_v12 }
  0xef   :  { %v131_v14 = vsub.f32 %v117_v4, %v130_v13 }
  0xf1   :  { %v132_v15 = vmul.f32 %v131_v14, %v131_v14 }
  0xf3   :  { %v133_v16 = vsel %vm121_vm2, %v132_v15, 0.0 }
  0xf4   :  { %v134_v17 = vrot.slane %v133_v16, 4 }
  0xf6   :  { %v135_v18 = vadd.f32 %v134_v17, %v133_v16 }
  0xf8   :  { %v136_v19 = vrot.slane %v135_v18, 2 }
  0xfa   :  { %v137_v20 = vadd.f32 %v136_v19, %v135_v18 }
  0xfc   :  { %v138_v21 = vrot.slane %v137_v20, 1 }
  0xfe   :  { %v139_v22 = vadd.f32 %v138_v21, %v137_v20 }
 0x100   :  { %v140_v23 = vmul.f32 0.125, %v139_v22 }
 0x102   :  { %v142_v24 = vadd.f32 1e-05, %v140_v23 }
 0x104   :  { %203 = vrsqrt.f32 %v142_v24 }
 0x111   :  { %v204_v29 = vpop.eup %203 }
 0x112   :  { %v144_v30 = vmul.f32 %v204_v29, %v141_v27 }
 0x114   :  { %v149_v31 = vrot.slane %v144_v30, %v148_v28 }
 0x116   :  { %v151_v33 = vmul.f32 %v149_v31, %v131_v14 }
 0x118   :  { %v159_v34 = vadd.f32 %v184_v32, %v151_v33 }
 0x11a   :  { %v160_v35 = vmax.f32 %v159_v34, 0.0 }
 0x11c   :  { %161 = vst.msk [vmem:[#allocation7] sm:$0xff] %vm121_vm2, %v160_v35 }
 0x11d   :  { %166 = vst.msk [vmem:[#allocation7] sm:$0xff] %vm165_vm3, %v163_v36 }
 0x11e   :  { %256 = shalt.err (!%p253_p0)
}
 0x11f   :  { %176 = dma.vmem_to_hbm [thread:$0]  %s174_s5, 128, %s326_s4, [#allocation4]  }
 0x120   :  { %269 = dma.done.wait [#allocation4], 128  }
 0x121   :  { %270 = vsyncadd [#allocation4], 4294967168 }
 0x122   :  { %180 = vsyncpa [#allocation3], 1 }
 0x123   :  { %181 = vsyncpa [#allocation6], 1 }
 0x124   :  { %182 = vsyncpa [#allocation4], 1 }

</bundles_post_ra>
